<compile_context>
chip_gen: v6e
topology: v6e:2x2x1
jax: 0.10.0
libtpu: 0.0.40
codegen_flags: <defaults>
</compile_context>

<pallas_src>
import functools
import math

import jax
import jax.numpy as jnp
from jax.experimental import pallas as pl
from jax.experimental.pallas import tpu as pltpu


def bilinear_up2_matrix(n_in):
    """(2*n_in, n_in) operator matrix for PyTorch bilinear x2 upsample, align_corners=False."""
    n_out = 2 * n_in
    mat = [[0.0] * n_in for _ in range(n_out)]
    for i in range(n_out):
        src = 0.5 * (i + 0.5) - 0.5
        if src < 0.0:
            src = 0.0
        i0 = int(math.floor(src))
        if i0 > n_in - 1:
            i0 = n_in - 1
        i1 = min(i0 + 1, n_in - 1)
        frac = src - float(i0)
        mat[i][i0] += 1.0 - frac
        mat[i][i1] += frac
    return jnp.array(mat, jnp.float32)


def _conv_upsample_kernel(x2_ref, vt_ref, m2_ref, mask_ref, gamma_ref, beta_ref, o_ref,
                          *, CB, Ho, NL, eps, inv_count):
    # ---- 1) W-axis bilinear upsample, conv W-padding + per-batch lane blocks baked into
    #         the block-diagonal operator: one MXU matmul, output already conv-ready.
    t = jnp.dot(x2_ref[...], vt_ref[...], preferred_element_type=jnp.float32)  # (Cin*H, NL+8)

    # ---- 2) Stack the three dx tap windows -> one wide (3*Cin*H, NL) operand, then one
    #         MXU matmul fusing H-upsample + 3x3 conv + channel mixing for this block.
    r = jnp.concatenate([t[:, 0:NL], t[:, 1:NL + 1], t[:, 2:NL + 2]], axis=0)
    y = jnp.dot(m2_ref[...], r, preferred_element_type=jnp.float32)            # (CB*Ho, NL)
    y3 = y.reshape(CB, Ho, NL)          # whole-tile regroup (Ho % 8 == 0, NL % 128 == 0)

    # ---- 3) BatchNorm (single-device training-mode batch stats, centered two-pass) +
    #         ReLU; the output is written exactly once, lane-dense and unmasked.
    mask = mask_ref[...].reshape(1, 1, NL)             # 1.0 on valid (n, q < Wo) lanes
    s = jnp.sum(jnp.sum(y3 * mask, axis=2, keepdims=True), axis=1, keepdims=True)
    mean = s * inv_count                               # (CB, 1, 1)
    d = (y3 - mean) * mask
    var = jnp.sum(jnp.sum(d * d, axis=2, keepdims=True), axis=1, keepdims=True) * inv_count
    gamma = gamma_ref[...].reshape(CB, 1, 1)
    beta = beta_ref[...].reshape(CB, 1, 1)
    scale = gamma * jax.lax.rsqrt(var + eps)
    shift = beta - mean * scale
    o_ref[...] = jnp.maximum(y3 * scale + shift, 0.0)


def conv_upsample_3x3(x, w, gamma, beta, eps=1e-5):
    """x: (N, Cin, H, W) f32; w: (Cout, Cin, 3, 3); gamma/beta: (Cout,). Returns (N, Cout, 2H, 2W)."""
    N, Cin, H, W = x.shape
    Cout = w.shape[0]
    Ho, Wo = 2 * H, 2 * W
    HoP, WoP = Ho + 2, Wo + 2
    CinH = Cin * H
    K3 = 3 * CinH

    # Per-batch lane stride: round up so the total lane width N*WROW is a multiple of 128
    # when possible (lane-dense, unmasked output stores); always >= WoP.
    WROW = WoP
    if 128 % N == 0:
        blk = 128 // N
        WROW = max(WoP, -(-WoP // blk) * blk)
    NL = N * WROW
    TW = NL + 8                  # zero tail so the dx=1,2 lane windows never read out of range

    # Channel blocking for the parallel grid (per-channel BN stats => blocks independent).
    NBLK = 2 if (Cout % 2 == 0 and Cout >= 2) else 1
    CB = Cout // NBLK
    if (CB * Ho) % 8 != 0:
        NBLK, CB = 1, Cout

    xf = jnp.asarray(x, jnp.float32)
    wf = jnp.asarray(w, jnp.float32)

    # ---- static fused operators (wrapper-side, tiny) -----------------------------------
    UpPad = jnp.zeros((HoP, H), jnp.float32).at[1:1 + Ho, :].set(bilinear_up2_matrix(H))
    VtP = jnp.zeros((W, WoP), jnp.float32).at[:, 1:1 + Wo].set(bilinear_up2_matrix(W).T)
    vt_big = jnp.zeros((N * W, TW), jnp.float32)
    for n in range(N):
        vt_big = vt_big.at[n * W:(n + 1) * W, n * WROW:n * WROW + WoP].set(VtP)
    # M2[co*Ho+p, (dx*Cin+ci)*H+h] = sum_dy w[co,ci,dy,dx] * UpPad[p+dy, h]
    A = jnp.stack([UpPad[dy:dy + Ho] for dy in range(3)], axis=0)        # (3, Ho, H)
    M2 = jnp.einsum('oiyx,yph->opxih', wf, A).reshape(Cout * Ho, K3)     # (Cout*Ho, 3*Cin*H)

    # ---- data / parameters --------------------------------------------------------------
    x2 = xf.transpose(1, 2, 0, 3).reshape(CinH, N * W)                   # rows (ci,h), cols (n,w)
    mask = ((jnp.arange(NL, dtype=jnp.int32) % WROW) < Wo).astype(jnp.float32).reshape(1, NL)
    gamma3 = jnp.asarray(gamma, jnp.float32).reshape(NBLK, CB, 1)
    beta3 = jnp.asarray(beta, jnp.float32).reshape(NBLK, CB, 1)

    kernel = functools.partial(
        _conv_upsample_kernel, CB=CB, Ho=Ho, NL=NL,
        eps=float(eps), inv_count=1.0 / float(N * Ho * Wo))

    out = pl.pallas_call(
        kernel,
        out_shape=jax.ShapeDtypeStruct((Cout, Ho, NL), jnp.float32),
        grid=(NBLK,),
        in_specs=[
            pl.BlockSpec((CinH, N * W), lambda i: (0, 0)),      # x2      (shared)
            pl.BlockSpec((N * W, TW), lambda i: (0, 0)),        # vt_big  (shared)
            pl.BlockSpec((CB * Ho, K3), lambda i: (i, 0)),      # M2      (per channel block)
            pl.BlockSpec((1, NL), lambda i: (0, 0)),            # mask    (shared)
            pl.BlockSpec((1, CB, 1), lambda i: (i, 0, 0)),      # gamma   (per channel block)
            pl.BlockSpec((1, CB, 1), lambda i: (i, 0, 0)),      # beta    (per channel block)
        ],
        out_specs=pl.BlockSpec((CB, Ho, NL), lambda i: (i, 0, 0)),
        compiler_params=pltpu.CompilerParams(dimension_semantics=("parallel",)),
    )(x2, vt_big, M2, mask, gamma3, beta3)

    # layout plumbing only: drop the per-batch lane padding, restore NCHW
    return out.reshape(Cout, Ho, N, WROW)[:, :, :, :Wo].transpose(2, 0, 1, 3)


def reference(x, w, gamma, beta, eps=1e-5):
    """Pure-JAX reference with identical semantics (for self-check)."""
    U = bilinear_up2_matrix(x.shape[2])
    V = bilinear_up2_matrix(x.shape[3])
    up = jnp.einsum('ph,nchw->ncpw', U, x)
    up = jnp.einsum('qw,ncpw->ncpq', V, up)
    y = jax.lax.conv_general_dilated(up, w, window_strides=(1, 1), padding='SAME',
                                     dimension_numbers=('NCHW', 'OIHW', 'NCHW'))
    mean = jnp.mean(y, axis=(0, 2, 3), keepdims=True)
    var = jnp.mean((y - mean) ** 2, axis=(0, 2, 3), keepdims=True)
    yn = (y - mean) * jax.lax.rsqrt(var + eps)
    yn = yn * gamma.reshape(1, -1, 1, 1) + beta.reshape(1, -1, 1, 1)
    return jnp.maximum(yn, 0.0)


if __name__ == "__main__":
    key = jax.random.PRNGKey(0)
    kx, kw, kg, kb = jax.random.split(key, 4)

    N, Cin, Cout, H, W = 2, 4, 8, 16, 16
    x = jax.random.normal(kx, (N, Cin, H, W), jnp.float32)
    w = 0.1 * jax.random.normal(kw, (Cout, Cin, 3, 3), jnp.float32)
    # BN affine parameters (learnable in the module); perturb from the defaults so the
    # affine path is actually exercised by the self-check.
    gamma = 1.0 + 0.1 * jax.random.normal(kg, (Cout,), jnp.float32)
    beta = 0.1 * jax.random.normal(kb, (Cout,), jnp.float32)

    out = conv_upsample_3x3(x, w, gamma, beta)
    out = jax.block_until_ready(out)

    ref = reference(x, w, gamma, beta)
    assert out.shape == (N, Cout, 2 * H, 2 * W), out.shape
    max_err = float(jnp.max(jnp.abs(out - ref)))
    assert max_err < 1e-3, f"max abs err {max_err}"

    print("KERNEL_OK")
</pallas_src>

<mosaic_0001>
module attributes {stable_mosaic.version = 11 : i64} {
  func.func @_conv_upsample_kernel(%arg0: i32, %arg1: memref<64x32xf32, #tpu.memory_space<vmem>>, %arg2: memref<32x136xf32, #tpu.memory_space<vmem>>, %arg3: memref<128x192xf32, #tpu.memory_space<vmem>>, %arg4: memref<1x128xf32, #tpu.memory_space<vmem>>, %arg5: memref<1x4x1xf32, #tpu.memory_space<vmem>>, %arg6: memref<1x4x1xf32, #tpu.memory_space<vmem>>, %arg7: memref<4x32x128xf32, #tpu.memory_space<vmem>>) attributes {dimension_semantics = [#tpu.dimension_semantics<parallel>], iteration_bounds = array<i64: 2>, scalar_prefetch = 0 : i64, scratch_operands = 0 : i64, tpu.core_type = #tpu.core_type<tc>, window_params = [{pipeline_mode = #tpu.pipeline_mode<synchronous>, transform_indices = @transform_0, window_bounds = array<i64: 64, 32>}, {pipeline_mode = #tpu.pipeline_mode<synchronous>, transform_indices = @transform_1, window_bounds = array<i64: 32, 136>}, {transform_indices = @transform_2, window_bounds = array<i64: 128, 192>}, {pipeline_mode = #tpu.pipeline_mode<synchronous>, transform_indices = @transform_3, window_bounds = array<i64: 1, 128>}, {transform_indices = @transform_4, window_bounds = array<i64: 1, 4, 1>}, {transform_indices = @transform_5, window_bounds = array<i64: 1, 4, 1>}, {transform_indices = @transform_6, window_bounds = array<i64: 4, 32, 128>}]} {
    %c0 = arith.constant 0 : index
    %c0_0 = arith.constant 0 : index
    %0 = vector.load %arg1[%c0, %c0_0] : memref<64x32xf32, #tpu.memory_space<vmem>>, vector<64x32xf32>
    %c0_1 = arith.constant 0 : index
    %c0_2 = arith.constant 0 : index
    %1 = vector.load %arg2[%c0_1, %c0_2] : memref<32x136xf32, #tpu.memory_space<vmem>>, vector<32x136xf32>
    %cst = arith.constant dense<0.000000e+00> : vector<64x136xf32>
    %2 = tpu.matmul %0, %1, %cst {dimension_numbers = #tpu.dot_dimension_numbers<[1], [0], [0], [1], [0, 0, 1, 1], [], []>} : vector<64x32xf32>, vector<32x136xf32>, vector<64x136xf32> -> vector<64x136xf32>
    %3 = vector.extract_strided_slice %2 {offsets = [0, 0], sizes = [64, 128], strides = [1, 1]} : vector<64x136xf32> to vector<64x128xf32>
    %4 = vector.extract_strided_slice %2 {offsets = [0, 1], sizes = [64, 128], strides = [1, 1]} : vector<64x136xf32> to vector<64x128xf32>
    %5 = vector.extract_strided_slice %2 {offsets = [0, 2], sizes = [64, 128], strides = [1, 1]} : vector<64x136xf32> to vector<64x128xf32>
    %6 = tpu.concatenate %3, %4, %5 in 0 : vector<64x128xf32>, vector<64x128xf32>, vector<64x128xf32> -> vector<192x128xf32>
    %c0_3 = arith.constant 0 : index
    %c0_4 = arith.constant 0 : index
    %7 = vector.load %arg3[%c0_3, %c0_4] : memref<128x192xf32, #tpu.memory_space<vmem>>, vector<128x192xf32>
    %cst_5 = arith.constant dense<0.000000e+00> : vector<128x128xf32>
    %8 = tpu.matmul %7, %6, %cst_5 {dimension_numbers = #tpu.dot_dimension_numbers<[1], [0], [0], [1], [0, 0, 1, 1], [], []>} : vector<128x192xf32>, vector<192x128xf32>, vector<128x128xf32> -> vector<128x128xf32>
    %9 = vector.shape_cast %8 : vector<128x128xf32> to vector<4x32x128xf32>
    %c0_6 = arith.constant 0 : index
    %c0_7 = arith.constant 0 : index
    %10 = vector.load %arg4[%c0_6, %c0_7] : memref<1x128xf32, #tpu.memory_space<vmem>>, vector<1x128xf32>
    %11 = vector.shape_cast %10 : vector<1x128xf32> to vector<1x1x128xf32>
    %12 = vector.broadcast %11 : vector<1x1x128xf32> to vector<4x32x128xf32>
    %13 = arith.mulf %9, %12 : vector<4x32x128xf32>
    %cst_8 = arith.constant dense<0.000000e+00> : vector<4x32xf32>
    %14 = vector.multi_reduction <add>, %13, %cst_8 [2] : vector<4x32x128xf32> to vector<4x32xf32>
    %15 = vector.shape_cast %14 : vector<4x32xf32> to vector<4x32x1xf32>
    %cst_9 = arith.constant dense<0.000000e+00> : vector<4x1xf32>
    %16 = vector.multi_reduction <add>, %15, %cst_9 [1] : vector<4x32x1xf32> to vector<4x1xf32>
    %17 = vector.shape_cast %16 : vector<4x1xf32> to vector<4x1x1xf32>
    %cst_10 = arith.constant 4.8828125E-4 : f32
    %18 = vector.broadcast %cst_10 : f32 to vector<4x1x1xf32>
    %19 = arith.mulf %17, %18 : vector<4x1x1xf32>
    %20 = vector.broadcast %19 : vector<4x1x1xf32> to vector<4x32x128xf32>
    %21 = arith.subf %9, %20 : vector<4x32x128xf32>
    %22 = vector.broadcast %11 : vector<1x1x128xf32> to vector<4x32x128xf32>
    %23 = arith.mulf %21, %22 : vector<4x32x128xf32>
    %24 = arith.mulf %23, %23 : vector<4x32x128xf32>
    %cst_11 = arith.constant dense<0.000000e+00> : vector<4x32xf32>
    %25 = vector.multi_reduction <add>, %24, %cst_11 [2] : vector<4x32x128xf32> to vector<4x32xf32>
    %26 = vector.shape_cast %25 : vector<4x32xf32> to vector<4x32x1xf32>
    %cst_12 = arith.constant dense<0.000000e+00> : vector<4x1xf32>
    %27 = vector.multi_reduction <add>, %26, %cst_12 [1] : vector<4x32x1xf32> to vector<4x1xf32>
    %28 = vector.shape_cast %27 : vector<4x1xf32> to vector<4x1x1xf32>
    %cst_13 = arith.constant 4.8828125E-4 : f32
    %29 = vector.broadcast %cst_13 : f32 to vector<4x1x1xf32>
    %30 = arith.mulf %28, %29 : vector<4x1x1xf32>
    %c0_14 = arith.constant 0 : index
    %c0_15 = arith.constant 0 : index
    %c0_16 = arith.constant 0 : index
    %31 = vector.load %arg5[%c0_14, %c0_15, %c0_16] : memref<1x4x1xf32, #tpu.memory_space<vmem>>, vector<1x4x1xf32>
    %32 = vector.shape_cast %31 : vector<1x4x1xf32> to vector<4x1x1xf32>
    %c0_17 = arith.constant 0 : index
    %c0_18 = arith.constant 0 : index
    %c0_19 = arith.constant 0 : index
    %33 = vector.load %arg6[%c0_17, %c0_18, %c0_19] : memref<1x4x1xf32, #tpu.memory_space<vmem>>, vector<1x4x1xf32>
    %34 = vector.shape_cast %33 : vector<1x4x1xf32> to vector<4x1x1xf32>
    %cst_20 = arith.constant 9.99999974E-6 : f32
    %35 = vector.broadcast %cst_20 : f32 to vector<4x1x1xf32>
    %36 = arith.addf %30, %35 : vector<4x1x1xf32>
    %37 = math.rsqrt %36 : vector<4x1x1xf32>
    %38 = arith.mulf %32, %37 : vector<4x1x1xf32>
    %39 = arith.mulf %19, %38 : vector<4x1x1xf32>
    %40 = arith.subf %34, %39 : vector<4x1x1xf32>
    %41 = vector.broadcast %38 : vector<4x1x1xf32> to vector<4x32x128xf32>
    %42 = arith.mulf %9, %41 : vector<4x32x128xf32>
    %43 = vector.broadcast %40 : vector<4x1x1xf32> to vector<4x32x128xf32>
    %44 = arith.addf %42, %43 : vector<4x32x128xf32>
    %cst_21 = arith.constant 0.000000e+00 : f32
    %45 = vector.broadcast %cst_21 : f32 to vector<4x32x128xf32>
    %46 = arith.maximumf %44, %45 : vector<4x32x128xf32>
    %c0_22 = arith.constant 0 : index
    %c0_23 = arith.constant 0 : index
    %c0_24 = arith.constant 0 : index
    %47 = vector.load %arg7[%c0_22, %c0_23, %c0_24] : memref<4x32x128xf32, #tpu.memory_space<vmem>>, vector<4x32x128xf32>
    tpu.vector_store %arg7[%c0_22, %c0_23, %c0_24], %46 {strides = array<i32>} : memref<4x32x128xf32, #tpu.memory_space<vmem>>, vector<4x32x128xf32>,
    return
  }
  func.func @transform_0(%arg0: i32) -> (i32, i32) {
    %c0_i32 = arith.constant 0 : i32
    %c0_i32_0 = arith.constant 0 : i32
    %c0_i32_1 = arith.constant 0 : i32
    return %c0_i32, %c0_i32_0 : i32, i32
  }
  func.func @transform_1(%arg0: i32) -> (i32, i32) {
    %c0_i32 = arith.constant 0 : i32
    %c0_i32_0 = arith.constant 0 : i32
    %c0_i32_1 = arith.constant 0 : i32
    return %c0_i32, %c0_i32_0 : i32, i32
  }
  func.func @transform_2(%arg0: i32) -> (i32, i32) {
    %c0_i32 = arith.constant 0 : i32
    %c0_i32_0 = arith.constant 0 : i32
    return %arg0, %c0_i32 : i32, i32
  }
  func.func @transform_3(%arg0: i32) -> (i32, i32) {
    %c0_i32 = arith.constant 0 : i32
    %c0_i32_0 = arith.constant 0 : i32
    %c0_i32_1 = arith.constant 0 : i32
    return %c0_i32, %c0_i32_0 : i32, i32
  }
  func.func @transform_4(%arg0: i32) -> (i32, i32, i32) {
    %c0_i32 = arith.constant 0 : i32
    %c0_i32_0 = arith.constant 0 : i32
    %c0_i32_1 = arith.constant 0 : i32
    return %arg0, %c0_i32, %c0_i32_0 : i32, i32, i32
  }
  func.func @transform_5(%arg0: i32) -> (i32, i32, i32) {
    %c0_i32 = arith.constant 0 : i32
    %c0_i32_0 = arith.constant 0 : i32
    %c0_i32_1 = arith.constant 0 : i32
    return %arg0, %c0_i32, %c0_i32_0 : i32, i32, i32
  }
  func.func @transform_6(%arg0: i32) -> (i32, i32, i32) {
    %c0_i32 = arith.constant 0 : i32
    %c0_i32_0 = arith.constant 0 : i32
    %c0_i32_1 = arith.constant 0 : i32
    return %arg0, %c0_i32, %c0_i32_0 : i32, i32, i32
  }
}

</mosaic_0001>

<bundles_post_ra>
// kernel: tpu_custom_call.1
= control target key start
LH: loop header
LB: loop body
LE: loop exit
PB: predicated region body
PF: predicated region fallthrough
CT: control target
= control target key end

     0   :  { %11 = vsyncpa [#allocation3], 0  ;;  %s2081_s0 = inlined_call_operand.vmem [shape: f32[64,32], index: 0, kind: input, shape index: {}]   ;;  %s2082_s1 = inlined_call_operand.vmem [shape: f32[32,136], index: 1, kind: input, shape index: {}]   ;;  %s2083_s2 = inlined_call_operand.vmem [shape: f32[256,192], index: 2, kind: input, shape index: {}]   ;;  %s2084_s3 = inlined_call_operand.vmem [shape: f32[1,128], index: 3, kind: input, shape index: {}]   ;;  %s2085_s4 = inlined_call_operand.vmem [shape: f32[2,4,1], index: 4, kind: input, shape index: {}]   ;;  %s2086_s5 = inlined_call_operand.vmem [shape: f32[2,4,1], index: 5, kind: input, shape index: {}]   ;;  %s2087_s6 = inlined_call_operand.hbm [shape: f32[8,32,128], index: 6, kind: output, shape index: {}]  }
   0x1   :  { %13 = vsyncpa [#allocation3 + $0x1], 0  ;;  %s1571_s21 = smov 0   ;;  %s1573_s22 = smov 0  }
   0x2   :  { %s1575_s23 = smov 0   ;;  %s1577_s24 = smov 0  }
   0x3 LB: > { %s1592_s25 = sadd.s32 4294967295, %s1526_s24   ;;  %s1316_s26 = sadd.s32 4294967294, %s1526_s24   ;;  %s1526_s24 = sphi %s1577_s24, %s2093_s24   ;;  %s1522_s23 = sphi %s1575_s23, %s2092_s23   ;;  %s1518_s22 = sphi %s1573_s22, %s2091_s22   ;;  %s1514_s21 = sphi %s1571_s21, %s2090_s21  }
   0x4   : > { %s1596_s27 = sadd.s32 1, %s1526_s24   ;;  %s167_s28 = sadd.s32 1, %s1522_s23 }
   0x5   : > { %s164_s29 = ssub.s32 %s1526_s24, %s1596_s27  ;;  %p177_p0 = scmp.ne.s32.totalorder %s1522_s23, %s1518_s22 }
   0x6   : > { %p165_p1 = scmp.eq.s32.totalorder %s164_s29, 0  ;;  %p178_p2 = scmp.eq.s32.totalorder %s1592_s25, 1 }
   0x7   : > { %p183_p3 = scmp.ne.s32.totalorder %s1518_s22, %s1514_s21  ;;  %p184_p4 = scmp.eq.s32.totalorder %s1316_s26, 1 }
   0x8   : > { %s1607_s30 = scalar_select %p165_p1, %s1522_s23, %s167_s28  }
   0x9   : > { %p1609_p5 = por %p178_p2, %p177_p0  ;;  %p1613_p6 = por %p184_p4, %p183_p3 }
   0xa   : > { %p1319_p7 = scmp.ge.s32.totalorder %s1526_s24, 1  ;;  %p235_p8 = scmp.lt.s32.totalorder %s1526_s24, 3 }
   0xc   : > { %p236_p9 = pnand %p1319_p7, %p235_p8 }
   0xd   : > { %s1529_s11 = smov (!%p236_p9), 127   ;;  %s1530_s12 = smov (!%p236_p9), 126  }
   0xe   : > { %239 = sbr.rel (%p236_p9) target bundleno = 1158 (0x486), region = 44  ;;  %s1321_s13 = sshll.u32 (!%p236_p9), %s1592_s25, 4 }
   0xf   : > { %p275_p10 = scmp.lt.s32.totalorder (!%p236_p9), %s1321_s13, 31  ;;  %p281_p11 = scmp.lt.s32.totalorder (!%p236_p9), %s1592_s25, 1 }
  0x10   : > { %s1361_s16 = sshll.u32 (!%p236_p9), %s1592_s25, 11  ;;  %s1533_s28 = smov (!%p236_p9), [#allocation2]  }
  0x11   : > { %s1470_s29 = sshll.u32 (!%p236_p9), %s1533_s28, 4  ;;  %s1471_s29 = int_to_ptr.vmem [resolvable:$false] %s1470_s29 }
  0x13   : > { %v305_v0 = vld [vmem:[%s2082_s1 + $0x38] sm:$0xff]  ;;  %v304_v1 = vld [vmem:[%s2082_s1 + $0x30] sm:$0xff]  ;;  %v303_v2 = vld [vmem:[%s2082_s1 + $0x28] sm:$0xff]  ;;  %v1528_v4 = vmov 0.0   ;;  %vm306_vm0 = vcmask 261120   ;;  %s2095_s13 = smov (!%p275_p10, %s1321_s13), 31 }
  0x14   : > { %355 = vmatprep.subr.mxu0 %v305_v0  ;;  %v302_v3 = vld [vmem:[%s2082_s1 + $0x20] sm:$0xff]  ;;  %395 = vmatprep.mubr.f32.mxu0 %v1528_v4  ;;  %v301_v5 = vld [vmem:[%s2082_s1 + $0x18] sm:$0xff]  ;;  %v300_v6 = vld [vmem:[%s2082_s1 + $0x10] sm:$0xff]  ;;  %s1359_s14 = sshll.u32 %s2095_s13, 4  ;;  %vm590_vm1 = vcmask 523264   ;;  %vm492_vm2 = vcmask 1039360  }
  0x15   : > { %356 = vmatpush1.msra.mxu0 %v304_v1  ;;  %1362 = vmatprep.subr.mxu1 %v1528_v4  ;;  %v299_v7 = vld [vmem:[%s2082_s1 + $0x8] sm:$0xff]  ;;  %v298_v8 = vld [vmem:[%s2082_s1] sm:$0xff]  ;;  %v292_v11 = vld [vmem:[%s2081_s0 + $0x10] sm:$0xff]  ;;  %s1717_s17 = scalar_lea.vmem %s2083_s2, %s1359_s14  ;;  %vm541_vm3 = vcmask 1031168   ;;  %s271_s13 = sand.u32 1, %s1518_s22  }
  0x16   : > { %357 = vmatprep.subr.mxu0 %v303_v2  ;;  %v290_v9 = vld [vmem:[%s2081_s0] sm:$0xff]  ;;  %v291_v10 = vld [vmem:[%s2081_s0 + $0x8] sm:$0xff]  ;;  %v293_v12 = vld [vmem:[%s2081_s0 + $0x18] sm:$0xff]  ;;  %s1976_s20 = scalar_select %p281_p11, %s1592_s25, 1 }
  0x17   : > { %358 = vmatpush1.msra.mxu0 %v302_v3  ;;  %v294_v13 = vld [vmem:[%s2081_s0 + $0x20] sm:$0xff]  ;;  %v295_v14 = vld [vmem:[%s2081_s0 + $0x28] sm:$0xff]  ;;  %v296_v15 = vld [vmem:[%s2081_s0 + $0x30] sm:$0xff]  ;;  %s1320_s14 = sshll.u32 %s271_s13, 7  ;;  %s2041_s25 = scalar_lea.sflag [#allocation3], %s271_s13 }
  0x18   : > { %359 = vmatprep.subr.mxu0 %v301_v5  ;;  %v297_v16 = vld [vmem:[%s2081_s0 + $0x38] sm:$0xff]  ;;  %v559_v33 = vld [vmem:[%s1717_s17 + $0x8] sm:$0xff]  ;;  %s1324_s26 = sshll.u32 %s1976_s20, 2  ;;  %s2004_s15 = scalar_lea.vmem [#allocation2], %s1320_s14 }
  0x19   : > { %360 = vmatpush1.msra.mxu0 %v300_v6  ;;  %v573_v34 = vld [vmem:[%s1717_s17 + $0x78] sm:$0xff]  ;;  %s284_s9 = scalar_lea.vmem %s2085_s4, %s1324_s26  ;;  %s2031_s20 = scalar_lea.hbm %s2087_s6, %s1361_s16 }
  0x1a   : > { %361 = vmatprep.subr.mxu0 %v299_v7  ;;  %1341 = vmatprep.mubr.msk.f32.mxu1 %vm590_vm1, %v573_v34  ;;  %v581_v34 = vld [vmem:[%s1717_s17 + $0xb8] sm:$0xff] }
  0x1b   : > { %362 = vmatpush1.msra.mxu0 %v298_v8 }
  0x1c   : > { %1326 = vmatmul.mubr.msk.f32.vlgmr.msra.gmra.mxu0 %vm306_vm0, %v290_v9  ;;  %639 = vmatprep.subr.mxu0 %v1528_v4 }
  0x1d   : > { %401 = vmatprep.mubr.f32.mxu0 %v1528_v4 }
  0x20   : > { %1327 = vmatmul.mubr.msk.f32.gmra.mxu0 %vm306_vm0, %v291_v10 }
  0x21   : > { %407 = vmatprep.mubr.f32.mxu0 %v1528_v4 }
  0x24   : > { %1328 = vmatmul.mubr.msk.f32.gmra.mxu0 %vm306_vm0, %v292_v11 }
  0x25   : > { %413 = vmatprep.mubr.f32.mxu0 %v1528_v4 }
  0x28   : > { %1329 = vmatmul.mubr.msk.f32.gmra.mxu0 %vm306_vm0, %v293_v12 }
  0x29   : > { %419 = vmatprep.mubr.f32.mxu0 %v1528_v4 }
  0x2c   : > { %1330 = vmatmul.mubr.msk.f32.gmra.mxu0 %vm306_vm0, %v294_v13 }
  0x2d   : > { %425 = vmatprep.mubr.f32.mxu0 %v1528_v4 }
  0x30   : > { %1331 = vmatmul.mubr.msk.f32.gmra.mxu0 %vm306_vm0, %v295_v14 }
  0x31   : > { %431 = vmatprep.mubr.f32.mxu0 %v1528_v4 }
  0x34   : > { %1332 = vmatmul.mubr.msk.f32.gmra.mxu0 %vm306_vm0, %v296_v15 }
  0x35   : > { %437 = vmatprep.mubr.f32.mxu0 %v1528_v4 }
  0x38   : > { %1333 = vmatmul.mubr.msk.f32.gmra.mxu0 %vm306_vm0, %v297_v16 }
  0x39   : > { %1334 = vmatprep.mubr.msk.f32.mxu0 %vm590_vm1, %v559_v33  ;;  %v567_v33 = vld [vmem:[%s1717_s17 + $0x48] sm:$0xff] }
  0xdc   : > { %v1685_v17 = vpop.f32.mrf.mxu0 }
  0xde   : > { %v399_v18 = vpop.f32.mrf.mxu0 }
  0xe0   : > { %v1687_v19 = vpop.f32.mrf.mxu0 }
  0xe2   : > { %v405_v20 = vpop.f32.mrf.mxu0 }
  0xe4   : > { %v1689_v21 = vpop.f32.mrf.mxu0 }
  0xe6   : > { %v411_v22 = vpop.f32.mrf.mxu0 }
  0xe8   : > { %v1691_v23 = vpop.f32.mrf.mxu0 }
  0xea   : > { %v417_v24 = vpop.f32.mrf.mxu0 }
  0xec   : > { %v1693_v25 = vpop.f32.mrf.mxu0 }
  0xed   : > { %476 = vrot.lane.b32.xlu0 %v1693_v25, %s1529_s11 }
  0xee   : > { %v423_v26 = vpop.f32.mrf.mxu0 }
  0xef   : > { %478 = vrot.lane.b32.xlu1 %v423_v26, %s1529_s11 }
  0xf0   : > { %v1696_v27 = vpop.f32.mrf.mxu0 }
  0xf1   : > { %480 = vrot.lane.b32.xlu0 %v1696_v27, %s1529_s11 }
  0xf2   : > { %v429_v28 = vpop.f32.mrf.mxu0 }
  0xf3   : > { %482 = vrot.lane.b32.xlu1 %v429_v28, %s1529_s11 }
  0xf4   : > { %v1699_v29 = vpop.f32.mrf.mxu0 }
  0xf6   : > { %v435_v30 = vpop.f32.mrf.mxu0 }
  0xf7   : > { %484 = vrot.lane.b32.xlu1 %v1699_v29, %s1529_s11 }
  0xf8   : > { %v1702_v31 = vpop.f32.mrf.mxu0 }
  0xf9   : > { %488 = vrot.lane.b32.xlu0 %v1702_v31, %s1529_s11 }
  0xfa   : > { %v441_v32 = vpop.f32.mrf.mxu0 }
  0xfb   : > { %486 = vrot.lane.b32.xlu1 %v435_v30, %s1529_s11 }
  0xfd   : > { %490 = vrot.lane.b32.xlu0 %v441_v32, %s1529_s11 }
  0xff   : > { %474 = vrot.lane.b32.xlu1 %v417_v24, %s1529_s11 }
 0x101   : > { %472 = vrot.lane.b32.xlu0 %v1691_v23, %s1529_s11 }
 0x103   : > { %470 = vrot.lane.b32.xlu1 %v411_v22, %s1529_s11 }
 0x105   : > { %468 = vrot.lane.b32.xlu0 %v1689_v21, %s1529_s11 }
 0x107   : > { %466 = vrot.lane.b32.xlu1 %v405_v20, %s1529_s11 }
 0x109   : > { %464 = vrot.lane.b32.xlu0 %v1687_v19, %s1529_s11 }
 0x10b   : > { %462 = vrot.lane.b32.xlu1 %v399_v18, %s1529_s11 }
 0x10d   : > { %460 = vrot.lane.b32.xlu0 %v1685_v17, %s1529_s11 }
 0x10f   : > { %535 = vrot.lane.b32.xlu1 %v435_v30, %s1530_s12  ;;  %v579_v30 = vld [vmem:[%s1717_s17 + $0xa8] sm:$0xff] }
 0x111   : > { %537 = vrot.lane.b32.xlu0 %v1702_v31, %s1530_s12 }
 0x113   : > { %531 = vrot.lane.b32.xlu1 %v429_v28, %s1530_s12  ;;  %v576_v28 = vld [vmem:[%s1717_s17 + $0x90] sm:$0xff] }
 0x115   : > { %533 = vrot.lane.b32.xlu0 %v1699_v29, %s1530_s12 }
 0x117   : > { %527 = vrot.lane.b32.xlu1 %v423_v26, %s1530_s12  ;;  %v563_v26 = vld [vmem:[%s1717_s17 + $0x28] sm:$0xff] }
 0x119   : > { %529 = vrot.lane.b32.xlu0 %v1696_v27, %s1530_s12 }
 0x11b   : > { %539 = vrot.lane.b32.xlu1 %v441_v32, %s1530_s12  ;;  %v578_v32 = vld [vmem:[%s1717_s17 + $0xa0] sm:$0xff] }
 0x11d   : > { %525 = vrot.lane.b32.xlu0 %v1693_v25, %s1530_s12 }
 0x11f   : > { %523 = vrot.lane.b32.xlu1 %v417_v24, %s1530_s12  ;;  %v560_v24 = vld [vmem:[%s1717_s17 + $0x10] sm:$0xff] }
 0x121   : > { %521 = vrot.lane.b32.xlu0 %v1691_v23, %s1530_s12 }
 0x123   : > { %519 = vrot.lane.b32.xlu1 %v411_v22, %s1530_s12  ;;  %v561_v22 = vld [vmem:[%s1717_s17 + $0x18] sm:$0xff] }
 0x125   : > { %517 = vrot.lane.b32.xlu0 %v1689_v21, %s1530_s12 }
 0x127   : > { %515 = vrot.lane.b32.xlu1 %v405_v20, %s1530_s12  ;;  %v572_v20 = vld [vmem:[%s1717_s17 + $0x70] sm:$0xff] }
 0x129   : > { %513 = vrot.lane.b32.xlu0 %v1687_v19, %s1530_s12 }
 0x12b   : > { %511 = vrot.lane.b32.xlu1 %v399_v18, %s1530_s12 }
 0x12d   : > { %509 = vrot.lane.b32.xlu0 %v1685_v17, %s1530_s12  ;;  %s288_s12 = scalar_lea.vmem %s2086_s5, %s1324_s26 }
 0x15f   : > { %v477_v35 = vpop.permute.xlu0 %476 }
 0x161   : > { %v479_v36 = vpop.permute.xlu1 %478 }
 0x162   : > { %v497_v49 = vsel %vm492_vm2, %v477_v35, %v479_v36  ;;  %v566_v35 = vld [vmem:[%s1717_s17 + $0x40] sm:$0xff]  ;;  %v580_v36 = vld [vmem:[%s1717_s17 + $0xb0] sm:$0xff] }
 0x163   : > { %v481_v38 = vpop.permute.xlu0 %480 }
 0x165   : > { %v483_v37 = vpop.permute.xlu1 %482 }
 0x166   : > { %v498_v47 = vsel %vm492_vm2, %v481_v38, %v483_v37  ;;  %v569_v37 = vld [vmem:[%s1717_s17 + $0x58] sm:$0xff]  ;;  %v583_v38 = vld [vmem:[%s1717_s17 + $0xc8] sm:$0xff] }
 0x169   : > { %v485_v39 = vpop.permute.xlu1 %484 }
 0x16b   : > { %v489_v40 = vpop.permute.xlu0 %488 }
 0x16d   : > { %v487_v41 = vpop.permute.xlu1 %486 }
 0x16e   : > { %v499_v45 = vsel %vm492_vm2, %v485_v39, %v487_v41  ;;  %v568_v39 = vld [vmem:[%s1717_s17 + $0x50] sm:$0xff]  ;;  %v585_v41 = vld [vmem:[%s1717_s17 + $0xd8] sm:$0xff] }
 0x16f   : > { %v491_v42 = vpop.permute.xlu0 %490 }
 0x170   : > { %v500_v43 = vsel %vm492_vm2, %v489_v40, %v491_v42  ;;  %v582_v40 = vld [vmem:[%s1717_s17 + $0xc0] sm:$0xff]  ;;  %v571_v42 = vld [vmem:[%s1717_s17 + $0x68] sm:$0xff] }
 0x171   : > { %v475_v44 = vpop.permute.xlu1 %474  ;;  %640 = vmatpush1.msra.mxu0 %v500_v43  ;;  %1386 = vmatpush1.msra.mxu1 %v500_v43  ;;  %v584_v43 = vld [vmem:[%s1717_s17 + $0xd0] sm:$0xff] }
 0x172   : > { %641 = vmatprep.subr.mxu0 %v1528_v4  ;;  %1363 = vmatprep.subr.mxu1 %v1528_v4 }
 0x173   : > { %642 = vmatpush1.msra.mxu0 %v499_v45  ;;  %1387 = vmatpush1.msra.mxu1 %v499_v45  ;;  %v473_v46 = vpop.permute.xlu0 %472  ;;  %v587_v45 = vld [vmem:[%s1717_s17 + $0xe8] sm:$0xff] }
 0x174   : > { %643 = vmatprep.subr.mxu0 %v1528_v4  ;;  %1364 = vmatprep.subr.mxu1 %v1528_v4  ;;  %v496_v51 = vsel %vm492_vm2, %v473_v46, %v475_v44  ;;  %v570_v44 = vld [vmem:[%s1717_s17 + $0x60] sm:$0xff] }
 0x175   : > { %v471_v48 = vpop.permute.xlu1 %470  ;;  %644 = vmatpush1.msra.mxu0 %v498_v47  ;;  %1388 = vmatpush1.msra.mxu1 %v498_v47  ;;  %v586_v46 = vld [vmem:[%s1717_s17 + $0xe0] sm:$0xff]  ;;  %v589_v47 = vld [vmem:[%s1717_s17 + $0xf8] sm:$0xff] }
 0x176   : > { %645 = vmatprep.subr.mxu0 %v1528_v4  ;;  %1365 = vmatprep.subr.mxu1 %v1528_v4 }
 0x177   : > { %646 = vmatpush1.msra.mxu0 %v497_v49  ;;  %1389 = vmatpush1.msra.mxu1 %v497_v49  ;;  %v469_v50 = vpop.permute.xlu0 %468  ;;  %v1852_v49 = vld [vmem:[%s2084_s3] ss:$0 sm:$0xff] }
 0x178   : > { %647 = vmatprep.subr.mxu0 %v1528_v4  ;;  %1366 = vmatprep.subr.mxu1 %v1528_v4  ;;  %v495_v53 = vsel %vm492_vm2, %v469_v50, %v471_v48  ;;  %v588_v48 = vld [vmem:[%s1717_s17 + $0xf0] sm:$0xff] }
 0x179   : > { %v467_v52 = vpop.permute.xlu1 %466  ;;  %648 = vmatpush1.msra.mxu0 %v496_v51  ;;  %1390 = vmatpush1.msra.mxu1 %v496_v51 }
 0x17a   : > { %649 = vmatprep.subr.mxu0 %v1528_v4  ;;  %1367 = vmatprep.subr.mxu1 %v1528_v4 }
 0x17b   : > { %650 = vmatpush1.msra.mxu0 %v495_v53  ;;  %1391 = vmatpush1.msra.mxu1 %v495_v53  ;;  %v465_v54 = vpop.permute.xlu0 %464 }
 0x17c   : > { %v494_v55 = vsel %vm492_vm2, %v465_v54, %v467_v52  ;;  %651 = vmatprep.subr.mxu0 %v1528_v4  ;;  %1368 = vmatprep.subr.mxu1 %v1528_v4 }
 0x17d   : > { %v463_v56 = vpop.permute.xlu1 %462  ;;  %652 = vmatpush1.msra.mxu0 %v494_v55  ;;  %1392 = vmatpush1.msra.mxu1 %v494_v55 }
 0x17e   : > { %653 = vmatprep.subr.mxu0 %v1528_v4  ;;  %1369 = vmatprep.subr.mxu1 %v1528_v4 }
 0x17f   : > { %v461_v57 = vpop.permute.xlu0 %460 }
 0x180   : > { %v493_v58 = vsel %vm492_vm2, %v461_v57, %v463_v56 }
 0x181   : > { %v536_v59 = vpop.permute.xlu1 %535  ;;  %654 = vmatpush1.msra.mxu0 %v493_v58  ;;  %1393 = vmatpush1.msra.mxu1 %v493_v58 }
 0x182   : > { %655 = vmatprep.subr.mxu0 %v1528_v4  ;;  %1370 = vmatprep.subr.mxu1 %v1528_v4 }
 0x183   : > { %656 = vmatpush1.msra.mxu0 %v1702_v31  ;;  %1394 = vmatpush1.msra.mxu1 %v1702_v31  ;;  %v538_v60 = vpop.permute.xlu0 %537  ;;  %v564_v31 = vld [vmem:[%s1717_s17 + $0x30] sm:$0xff] }
 0x184   : > { %657 = vmatprep.subr.mxu0 %v1528_v4  ;;  %1371 = vmatprep.subr.mxu1 %v1528_v4 }
 0x185   : > { %v532_v61 = vpop.permute.xlu1 %531  ;;  %658 = vmatpush1.msra.mxu0 %v1699_v29  ;;  %1395 = vmatpush1.msra.mxu1 %v1699_v29  ;;  %v565_v29 = vld [vmem:[%s1717_s17 + $0x38] sm:$0xff] }
 0x186   : > { %659 = vmatprep.subr.mxu0 %v1528_v4  ;;  %1372 = vmatprep.subr.mxu1 %v1528_v4 }
 0x187   : > { %660 = vmatpush1.msra.mxu0 %v1696_v27  ;;  %1396 = vmatpush1.msra.mxu1 %v1696_v27  ;;  %v534_v62 = vpop.permute.xlu0 %533  ;;  %v562_v27 = vld [vmem:[%s1717_s17 + $0x20] sm:$0xff] }
 0x188   : > { %661 = vmatprep.subr.mxu0 %v1528_v4  ;;  %1373 = vmatprep.subr.mxu1 %v1528_v4  ;;  %v548_v7 = vsel %vm541_vm3, %v534_v62, %v536_v59 }
 0x189   : > { %v528_v63 = vpop.permute.xlu1 %527  ;;  %662 = vmatpush1.msra.mxu0 %v1693_v25  ;;  %1397 = vmatpush1.msra.mxu1 %v1693_v25  ;;  %v574_v25 = vld [vmem:[%s1717_s17 + $0x80] sm:$0xff] }
 0x18a   : > { %663 = vmatprep.subr.mxu0 %v1528_v4  ;;  %1374 = vmatprep.subr.mxu1 %v1528_v4 }
 0x18b   : > { %664 = vmatpush1.msra.mxu0 %v1691_v23  ;;  %1398 = vmatpush1.msra.mxu1 %v1691_v23  ;;  %v530_v0 = vpop.permute.xlu0 %529  ;;  %v575_v23 = vld [vmem:[%s1717_s17 + $0x88] sm:$0xff] }
 0x18c   : > { %665 = vmatprep.subr.mxu0 %v1528_v4  ;;  %1375 = vmatprep.subr.mxu1 %v1528_v4  ;;  %v547_v9 = vsel %vm541_vm3, %v530_v0, %v532_v61 }
 0x18d   : > { %v540_v1 = vpop.permute.xlu1 %539  ;;  %666 = vmatpush1.msra.mxu0 %v1689_v21  ;;  %1399 = vmatpush1.msra.mxu1 %v1689_v21 }
 0x18e   : > { %667 = vmatprep.subr.mxu0 %v1528_v4  ;;  %1376 = vmatprep.subr.mxu1 %v1528_v4  ;;  %v549_v5 = vsel %vm541_vm3, %v538_v60, %v540_v1 }
 0x18f   : > { %668 = vmatpush1.msra.mxu0 %v1687_v19  ;;  %1400 = vmatpush1.msra.mxu1 %v1687_v19  ;;  %v526_v2 = vpop.permute.xlu0 %525  ;;  %v558_v19 = vld [vmem:[%s1717_s17] sm:$0xff] }
 0x190   : > { %669 = vmatprep.subr.mxu0 %v1528_v4  ;;  %1377 = vmatprep.subr.mxu1 %v1528_v4  ;;  %v546_v11 = vsel %vm541_vm3, %v526_v2, %v528_v63 }
 0x191   : > { %v524_v3 = vpop.permute.xlu1 %523  ;;  %670 = vmatpush1.msra.mxu0 %v1685_v17  ;;  %1401 = vmatpush1.msra.mxu1 %v1685_v17 }
 0x192   : > { %687 = vmatprep.subr.mxu0 %v1528_v4  ;;  %1378 = vmatprep.subr.mxu1 %v1528_v4 }
 0x193   : > { %688 = vmatpush2.msra.mxu0 %v549_v5  ;;  %1402 = vmatpush2.msra.mxu1 %v549_v5  ;;  %v522_v6 = vpop.permute.xlu0 %521 }
 0x194   : > { %689 = vmatprep.subr.mxu0 %v1528_v4  ;;  %1379 = vmatprep.subr.mxu1 %v1528_v4  ;;  %v545_v13 = vsel %vm541_vm3, %v522_v6, %v524_v3 }
 0x195   : > { %v520_v8 = vpop.permute.xlu1 %519  ;;  %690 = vmatpush2.msra.mxu0 %v548_v7  ;;  %1403 = vmatpush2.msra.mxu1 %v548_v7 }
 0x196   : > { %691 = vmatprep.subr.mxu0 %v1528_v4  ;;  %1380 = vmatprep.subr.mxu1 %v1528_v4 }
 0x197   : > { %692 = vmatpush2.msra.mxu0 %v547_v9  ;;  %1404 = vmatpush2.msra.mxu1 %v547_v9  ;;  %v518_v10 = vpop.permute.xlu0 %517 }
 0x198   : > { %693 = vmatprep.subr.mxu0 %v1528_v4  ;;  %1381 = vmatprep.subr.mxu1 %v1528_v4  ;;  %v544_v15 = vsel %vm541_vm3, %v518_v10, %v520_v8 }
 0x199   : > { %v516_v12 = vpop.permute.xlu1 %515  ;;  %694 = vmatpush2.msra.mxu0 %v546_v11  ;;  %1405 = vmatpush2.msra.mxu1 %v546_v11 }
 0x19a   : > { %695 = vmatprep.subr.mxu0 %v1528_v4  ;;  %1382 = vmatprep.subr.mxu1 %v1528_v4 }
 0x19b   : > { %696 = vmatpush2.msra.mxu0 %v545_v13  ;;  %1406 = vmatpush2.msra.mxu1 %v545_v13  ;;  %v514_v14 = vpop.permute.xlu0 %513 }
 0x19c   : > { %697 = vmatprep.subr.mxu0 %v1528_v4  ;;  %1383 = vmatprep.subr.mxu1 %v1528_v4  ;;  %v543_v16 = vsel %vm541_vm3, %v514_v14, %v516_v12 }
 0x19d   : > { %698 = vmatpush2.msra.mxu0 %v544_v15  ;;  %1407 = vmatpush2.msra.mxu1 %v544_v15  ;;  %v512_v17 = vpop.permute.xlu1 %511 }
 0x19e   : > { %699 = vmatprep.subr.mxu0 %v1528_v4  ;;  %1384 = vmatprep.subr.mxu1 %v1528_v4 }
 0x19f   : > { %700 = vmatpush2.msra.mxu0 %v543_v16  ;;  %1408 = vmatpush2.msra.mxu1 %v543_v16  ;;  %v510_v18 = vpop.permute.xlu0 %509 }
 0x1a0   : > { %v542_v21 = vsel %vm541_vm3, %v510_v18, %v512_v17  ;;  %701 = vmatprep.subr.mxu0 %v1528_v4  ;;  %1385 = vmatprep.subr.mxu1 %v1528_v4  ;;  %v577_v4 = vld [vmem:[%s1717_s17 + $0x98] sm:$0xff]  ;;  %s1230_s17 = sshll.u32 %s2004_s15, 4  ;;  %s2033_s17 = int_to_ptr.vmem [resolvable:$true] %s1230_s17 }
 0x1a1   : > { %702 = vmatpush2.msra.mxu0 %v542_v21  ;;  %1409 = vmatpush2.msra.mxu1 %v542_v21  ;;  %s1466_s26 = scalar_lea.vmem %s2033_s17, 2048  ;;  %p1473_p1 = scmp.lt.s32.totalorder %s2033_s17, %s1471_s29 }
 0x1a2   : > { %704 = vmatmul.mubr.f32.vlgmr.msra.gmra.mxu0 %v558_v19  ;;  %739 = vmatmul.mubr.f32.vlgmr.msra.gmra.mxu1 %v572_v20  ;;  %p1467_p12 = scmp.ne.s32.totalorder %s2033_s17, %s1466_s26 }
 0x1a3   : > { %1335 = vmatprep.mubr.msk.f32.mxu0 %vm590_vm1, %v561_v22  ;;  %1342 = vmatprep.mubr.msk.f32.mxu1 %vm590_vm1, %v575_v23 }
 0x1a4   : > { %p1468_p13 = pnand %p1467_p12, %p1609_p5 }
 0x1a6   : > { %709 = vmatmul.mubr.f32.gmra.mxu0 %v560_v24  ;;  %744 = vmatmul.mubr.f32.gmra.mxu1 %v574_v25  ;;  %p1469_p0 = pneg %p1468_p13 }
 0x1a7   : > { %1336 = vmatprep.mubr.msk.f32.mxu0 %vm590_vm1, %v563_v26  ;;  %1343 = vmatprep.mubr.msk.f32.mxu1 %vm590_vm1, %v577_v4 }
 0x1aa   : > { %714 = vmatmul.mubr.f32.gmra.mxu0 %v562_v27  ;;  %749 = vmatmul.mubr.f32.gmra.mxu1 %v576_v28 }
 0x1ab   : > { %1337 = vmatprep.mubr.msk.f32.mxu0 %vm590_vm1, %v565_v29  ;;  %1344 = vmatprep.mubr.msk.f32.mxu1 %vm590_vm1, %v579_v30 }
 0x1ae   : > { %719 = vmatmul.mubr.f32.gmra.mxu0 %v564_v31  ;;  %754 = vmatmul.mubr.f32.gmra.mxu1 %v578_v32 }
 0x1af   : > { %1338 = vmatprep.mubr.msk.f32.mxu0 %vm590_vm1, %v567_v33  ;;  %1345 = vmatprep.mubr.msk.f32.mxu1 %vm590_vm1, %v581_v34 }
 0x1b2   : > { %724 = vmatmul.mubr.f32.gmra.mxu0 %v566_v35  ;;  %759 = vmatmul.mubr.f32.gmra.mxu1 %v580_v36 }
 0x1b3   : > { %1339 = vmatprep.mubr.msk.f32.mxu0 %vm590_vm1, %v569_v37  ;;  %1346 = vmatprep.mubr.msk.f32.mxu1 %vm590_vm1, %v583_v38 }
 0x1b6   : > { %729 = vmatmul.mubr.f32.gmra.mxu0 %v568_v39  ;;  %764 = vmatmul.mubr.f32.gmra.mxu1 %v582_v40 }
 0x1b7   : > { %1347 = vmatprep.mubr.msk.f32.mxu1 %vm590_vm1, %v585_v41  ;;  %1340 = vmatprep.mubr.msk.f32.mxu0 %vm590_vm1, %v571_v42 }
 0x1ba   : > { %769 = vmatmul.mubr.f32.gmra.mxu1 %v584_v43  ;;  %734 = vmatmul.mubr.f32.gmra.mxu0 %v570_v44 }
 0x1bb   : > { %1348 = vmatprep.mubr.msk.f32.mxu1 %vm590_vm1, %v587_v45 }
 0x1be   : > { %774 = vmatmul.mubr.f32.gmra.mxu1 %v586_v46 }
 0x1bf   : > { %1349 = vmatprep.mubr.msk.f32.mxu1 %vm590_vm1, %v589_v47 }
 0x1c2   : > { %779 = vmatmul.mubr.f32.gmra.mxu1 %v588_v48 }
 0x262   : > { %v1854_v50 = vpop.f32.mrf.mxu0  ;;  %v1856_v51 = vpop.f32.mrf.mxu1 }
 0x263   : > { %v791_v52 = vmul.f32 %v1852_v49, %v1854_v50  ;;  %v798_v55 = vmul.f32 %v1852_v49, %v1856_v51 }
 0x264   : > { %v707_v53 = vpop.f32.mrf.mxu0  ;;  %v742_v54 = vpop.f32.mrf.mxu1 }
 0x265   : > { %807 = vadd.xlane.f32.xlu0 %v791_v52 }
 0x266   : > { %v1862_v56 = vpop.f32.mrf.mxu0  ;;  %v1864_v57 = vpop.f32.mrf.mxu1 }
 0x267   : > { %v792_v58 = vmul.f32 %v1852_v49, %v1862_v56  ;;  %v799_v61 = vmul.f32 %v1852_v49, %v1864_v57 }
 0x268   : > { %v712_v59 = vpop.f32.mrf.mxu0  ;;  %v747_v60 = vpop.f32.mrf.mxu1 }
 0x269   : > { %821 = vadd.xlane.f32.xlu0 %v798_v55  ;;  %809 = vadd.xlane.f32.xlu1 %v792_v58 }
 0x26a   : > { %v1870_v62 = vpop.f32.mrf.mxu0  ;;  %v1872_v63 = vpop.f32.mrf.mxu1 }
 0x26b   : > { %v800_v0 = vmul.f32 %v1852_v49, %v1872_v63  ;;  %v793_v3 = vmul.f32 %v1852_v49, %v1870_v62 }
 0x26c   : > { %v717_v1 = vpop.f32.mrf.mxu0  ;;  %v752_v2 = vpop.f32.mrf.mxu1 }
 0x26d   : > { %825 = vadd.xlane.f32.xlu0 %v800_v0  ;;  %823 = vadd.xlane.f32.xlu1 %v799_v61 }
 0x26e   : > { %v1878_v5 = vpop.f32.mrf.mxu0  ;;  %v1880_v6 = vpop.f32.mrf.mxu1 }
 0x26f   : > { %v801_v9 = vmul.f32 %v1852_v49, %v1880_v6  ;;  %v794_v15 = vmul.f32 %v1852_v49, %v1878_v5 }
 0x270   : > { %v722_v7 = vpop.f32.mrf.mxu0  ;;  %v757_v8 = vpop.f32.mrf.mxu1 }
 0x271   : > { %811 = vadd.xlane.f32.xlu1 %v793_v3 }
 0x272   : > { %v1884_v10 = vpop.f32.mrf.mxu0  ;;  %v1886_v11 = vpop.f32.mrf.mxu1 }
 0x273   : > { %v795_v12 = vmul.f32 %v1852_v49, %v1884_v10  ;;  %v802_v28 = vmul.f32 %v1852_v49, %v1886_v11 }
 0x274   : > { %v727_v13 = vpop.f32.mrf.mxu0  ;;  %v762_v14 = vpop.f32.mrf.mxu1 }
 0x275   : > { %827 = vadd.xlane.f32.xlu1 %v801_v9  ;;  %815 = vadd.xlane.f32.xlu0 %v795_v12 }
 0x276   : > { %v1892_v16 = vpop.f32.mrf.mxu0  ;;  %v1894_v17 = vpop.f32.mrf.mxu1 }
 0x277   : > { %v796_v18 = vmul.f32 %v1852_v49, %v1892_v16  ;;  %v803_v21 = vmul.f32 %v1852_v49, %v1894_v17 }
 0x278   : > { %v767_v19 = vpop.f32.mrf.mxu1  ;;  %v732_v20 = vpop.f32.mrf.mxu0 }
 0x279   : > { %813 = vadd.xlane.f32.xlu1 %v794_v15  ;;  %817 = vadd.xlane.f32.xlu0 %v796_v18 }
 0x27a   : > { %v1900_v22 = vpop.f32.mrf.mxu1  ;;  %v1902_v23 = vpop.f32.mrf.mxu0 }
 0x27b   : > { %v804_v24 = vmul.f32 %v1852_v49, %v1900_v22  ;;  %v797_v4 = vmul.f32 %v1852_v49, %v1902_v23 }
 0x27c   : > { %v772_v25 = vpop.f32.mrf.mxu1  ;;  %v737_v26 = vpop.f32.mrf.mxu0 }
 0x27d   : > { %831 = vadd.xlane.f32.xlu1 %v803_v21  ;;  %833 = vadd.xlane.f32.xlu0 %v804_v24 }
 0x27e   : > { %v1908_v27 = vpop.f32.mrf.mxu1 }
 0x27f   : > { %v805_v30 = vmul.f32 %v1852_v49, %v1908_v27 }
 0x280   : > { %v777_v29 = vpop.f32.mrf.mxu1 }
 0x281   : > { %829 = vadd.xlane.f32.xlu1 %v802_v28  ;;  %819 = vadd.xlane.f32.xlu0 %v797_v4 }
 0x282   : > { %v1914_v31 = vpop.f32.mrf.mxu1 }
 0x283   : > { %v806_v33 = vmul.f32 %v1852_v49, %v1914_v31 }
 0x284   : > { %v782_v32 = vpop.f32.mrf.mxu1 }
 0x285   : > { %835 = vadd.xlane.f32.xlu0 %v805_v30 }
 0x289   : > { %837 = vadd.xlane.f32.xlu0 %v806_v33 }
 0x2ee   : > { %v808_v34 = vpop.xlane.xlu0 %807 }
 0x2f2   : > { %v810_v35 = vpop.xlane.xlu1 %809  ;;  %v822_v36 = vpop.xlane.xlu0 %821 }
 0x2f3   : > { %v839_v42 = vadd.f32 %v810_v35, %v808_v34 }
 0x2f6   : > { %v824_v37 = vpop.xlane.xlu1 %823  ;;  %v826_v38 = vpop.xlane.xlu0 %825 }
 0x2f7   : > { %v857_v53 = vadd.f32 %v826_v38, %v824_v37 }
 0x2fa   : > { %v812_v39 = vpop.xlane.xlu1 %811 }
 0x2fb   : > { %v840_v43 = vadd.f32 %v839_v42, %v812_v39 }
 0x2fe   : > { %v828_v40 = vpop.xlane.xlu1 %827  ;;  %v816_v41 = vpop.xlane.xlu0 %815 }
 0x2ff   : > { %v858_v55 = vadd.f32 %v857_v53, %v828_v40 }
 0x302   : > { %v814_v44 = vpop.xlane.xlu1 %813  ;;  %v818_v45 = vpop.xlane.xlu0 %817 }
 0x303   : > { %v841_v46 = vadd.f32 %v840_v43, %v814_v44  ;;  %v848_v59 = vadd.f32 %v818_v45, %v816_v41 }
 0x305   : > { %v842_v47 = vrot.slane %v841_v46, 4 }
 0x306   : > { %v832_v48 = vpop.xlane.xlu1 %831  ;;  %v834_v52 = vpop.xlane.xlu0 %833 }
 0x307   : > { %v843_v54 = vadd.f32 %v842_v47, %v841_v46  ;;  %v866_v13 = vadd.f32 %v834_v52, %v832_v48 }
 0x309   : > { %v844_v58 = vrot.slane %v843_v54, 2 }
 0x30a   : > { %v830_v60 = vpop.xlane.xlu1 %829  ;;  %v820_v61 = vpop.xlane.xlu0 %819 }
 0x30b   : > { %v845_v0 = vadd.f32 %v844_v58, %v843_v54  ;;  %v859_v1 = vadd.f32 %v858_v55, %v830_v60  ;;  %v849_v2 = vadd.f32 %v848_v59, %v820_v61 }
 0x30d   : > { %v846_v3 = vrot.slane %v845_v0, 1  ;;  %v860_v7 = vrot.slane %v859_v1, 4  ;;  %v850_v8 = vadd.f32 %v849_v2, %v822_v36 }
 0x30e   : > { %v836_v9 = vpop.xlane.xlu0 %835 }
 0x30f   : > { %v847_v12 = vadd.f32 %v846_v3, %v845_v0  ;;  %v861_v14 = vadd.f32 %v860_v7, %v859_v1  ;;  %v851_v15 = vrot.slane %v850_v8, 4  ;;  %v867_v21 = vadd.f32 %v866_v13, %v836_v9 }
 0x311   : > { %v1918_v18 = vmul.f32 0.00048828125, %v847_v12  ;;  %v862_v19 = vrot.slane %v861_v14, 2  ;;  %v852_v20 = vadd.f32 %v851_v15, %v850_v8 }
 0x312   : > { %v838_v24 = vpop.xlane.xlu0 %837 }
 0x313   : > { %v863_v25 = vadd.f32 %v862_v19, %v861_v14  ;;  %v853_v26 = vrot.slane %v852_v20, 2  ;;  %v868_v4 = vadd.f32 %v867_v21, %v838_v24  ;;  %v879_v28 = vsub.f32 %v1854_v50, %v1918_v18 }
 0x314   : > { %v880_v29 = vsub.f32 %v1862_v56, %v1918_v18  ;;  %v881_v30 = vsub.f32 %v1870_v62, %v1918_v18  ;;  %v882_v38 = vsub.f32 %v1878_v5, %v1918_v18 }
 0x315   : > { %v864_v32 = vrot.slane %v863_v25, 1  ;;  %v854_v33 = vadd.f32 %v853_v26, %v852_v20  ;;  %v869_v34 = vrot.slane %v868_v4, 4  ;;  %v895_v35 = vmul.f32 %v1852_v49, %v879_v28 }
 0x316   : > { %v896_v36 = vmul.f32 %v1852_v49, %v880_v29  ;;  %v897_v37 = vmul.f32 %v1852_v49, %v881_v30  ;;  %v898_v48 = vmul.f32 %v1852_v49, %v882_v38 }
 0x317   : > { %v865_v39 = vadd.f32 %v864_v32, %v863_v25  ;;  %v855_v40 = vrot.slane %v854_v33, 1  ;;  %v870_v41 = vadd.f32 %v869_v34, %v868_v4  ;;  %v911_v42 = vmul.f32 %v895_v35, %v895_v35 }
 0x318   : > { %v912_v43 = vmul.f32 %v896_v36, %v896_v36  ;;  %v913_v47 = vmul.f32 %v897_v37, %v897_v37  ;;  %v914_v61 = vmul.f32 %v898_v48, %v898_v48 }
 0x319   : > { %v1931_v44 = vmul.f32 0.00048828125, %v865_v39  ;;  %v856_v45 = vadd.f32 %v855_v40, %v854_v33  ;;  %v871_v46 = vrot.slane %v870_v41, 2  ;;  %927 = vadd.xlane.f32.xlu1 %v911_v42 }
 0x31a   : > { %929 = vadd.xlane.f32.xlu0 %v912_v43 }
 0x31b   : > { %v1934_v52 = vmul.f32 0.00048828125, %v856_v45  ;;  %v872_v53 = vadd.f32 %v871_v46, %v870_v41  ;;  %v888_v54 = vsub.f32 %v1872_v63, %v1931_v44  ;;  %v887_v55 = vsub.f32 %v1864_v57, %v1931_v44 }
 0x31c   : > { %v889_v1 = vsub.f32 %v1880_v6, %v1931_v44  ;;  %v890_v30 = vsub.f32 %v1886_v11, %v1931_v44  ;;  %v1531_v46 = vmov 0  }
 0x31d   : > { %v873_v58 = vrot.slane %v872_v53, 1  ;;  %931 = vadd.xlane.f32.xlu1 %v913_v47  ;;  %v904_v59 = vmul.f32 %v1852_v49, %v888_v54  ;;  %v884_v60 = vsub.f32 %v1892_v16, %v1934_v52  ;;  %v903_v0 = vmul.f32 %v1852_v49, %v887_v55  ;;  %1457 = vset.pattern.permute.xlu0 %v1531_v46 }
 0x31e   : > { %v885_v8 = vsub.f32 %v1902_v23, %v1934_v52  ;;  %v905_v9 = vmul.f32 %v1852_v49, %v889_v1  ;;  %v886_v12 = vsub.f32 %v1856_v51, %v1934_v52  ;;  %v883_v13 = vsub.f32 %v1884_v10, %v1934_v52  ;;  %1456 = vset.pattern.permute.xlu1 %v1531_v46 }
 0x31f   : > { %v874_v2 = vadd.f32 %v873_v58, %v872_v53  ;;  %v920_v3 = vmul.f32 %v904_v59, %v904_v59  ;;  %v900_v7 = vmul.f32 %v1852_v49, %v884_v60  ;;  %v919_v15 = vmul.f32 %v903_v0, %v903_v0 }
 0x320   : > { %v901_v20 = vmul.f32 %v1852_v49, %v885_v8  ;;  %v921_v21 = vmul.f32 %v905_v9, %v905_v9  ;;  %v902_v24 = vmul.f32 %v1852_v49, %v886_v12  ;;  %v899_v26 = vmul.f32 %v1852_v49, %v883_v13 }
 0x321   : > { %933 = vadd.xlane.f32.xlu1 %v914_v61  ;;  %945 = vadd.xlane.f32.xlu0 %v920_v3  ;;  %v1954_v14 = vmul.f32 0.00048828125, %v874_v2  ;;  %v916_v19 = vmul.f32 %v900_v7, %v900_v7  ;;  %v906_v36 = vmul.f32 %v1852_v49, %v890_v30 }
 0x322   : > { %v917_v25 = vmul.f32 %v901_v20, %v901_v20  ;;  %v918_v29 = vmul.f32 %v902_v24, %v902_v24  ;;  %v915_v32 = vmul.f32 %v899_v26, %v899_v26  ;;  %v1532_v26 = vmov 1966171168  }
 0x323   : > { %v892_v4 = vsub.f32 %v1900_v22, %v1954_v14  ;;  %v891_v28 = vsub.f32 %v1894_v17, %v1954_v14  ;;  %v893_v35 = vsub.f32 %v1908_v27, %v1954_v14  ;;  %v894_v40 = vsub.f32 %v1914_v31, %v1954_v14 }
 0x324   : > { %v922_v42 = vmul.f32 %v906_v36, %v906_v36 }
 0x325   : > { %943 = vadd.xlane.f32.xlu1 %v919_v15  ;;  %937 = vadd.xlane.f32.xlu0 %v916_v19  ;;  %v908_v33 = vmul.f32 %v1852_v49, %v892_v4  ;;  %v907_v34 = vmul.f32 %v1852_v49, %v891_v28  ;;  %v909_v39 = vmul.f32 %v1852_v49, %v893_v35  ;;  %v1010_v4 = vunpack.c.l.s4 %v1532_v26 }
 0x326   : > { %v910_v43 = vmul.f32 %v1852_v49, %v894_v40 }
 0x327   : > { %v924_v37 = vmul.f32 %v908_v33, %v908_v33  ;;  %v923_v38 = vmul.f32 %v907_v34, %v907_v34  ;;  %v925_v41 = vmul.f32 %v909_v39, %v909_v39 }
 0x328   : > { %v926_v45 = vmul.f32 %v910_v43, %v910_v43 }
 0x329   : > { %947 = vadd.xlane.f32.xlu1 %v921_v21  ;;  %939 = vadd.xlane.f32.xlu0 %v917_v25 }
 0x32d   : > { %941 = vadd.xlane.f32.xlu0 %v918_v29  ;;  %935 = vadd.xlane.f32.xlu1 %v915_v32  ;;  %v1012_v32 = vlaneseq }
 0x331   : > { %953 = vadd.xlane.f32.xlu0 %v924_v37  ;;  %951 = vadd.xlane.f32.xlu1 %v923_v38  ;;  %v1011_v37 = vunpack.c.0.s8 %v1010_v4 }
 0x335   : > { %955 = vadd.xlane.f32.xlu0 %v925_v41  ;;  %949 = vadd.xlane.f32.xlu1 %v922_v42  ;;  %v1013_v41 = vshrl.u32 %v1012_v32, 7 }
 0x339   : > { %957 = vadd.xlane.f32.xlu0 %v926_v45 }
 0x3a2   : > { %v928_v47 = vpop.xlane.xlu1 %927 }
 0x3a3   : > { %v930_v48 = vpop.xlane.xlu0 %929 }
 0x3a4   : > { %v959_v54 = vadd.f32 %v930_v48, %v928_v47 }
 0x3a6   : > { %v932_v53 = vpop.xlane.xlu1 %931 }
 0x3a7   : > { %v960_v55 = vadd.f32 %v959_v54, %v932_v53  ;;  %v1014_v54 = vsub.s32 %v1011_v37, %v1013_v41 }
 0x3aa   : > { %v934_v58 = vpop.xlane.xlu1 %933  ;;  %v946_v59 = vpop.xlane.xlu0 %945 }
 0x3ab   : > { %v961_v60 = vadd.f32 %v960_v55, %v934_v58  ;;  %v1351_v55 = vld.sshfl [vmem:[%s284_s9] sm:$0x33 pattern:$0x75316420]  ;;  %s1472_s9 = scalar_lea.vmem %s1471_s29, 4096 }
 0x3ac   : > { %p1474_p2 = scmp.lt.s32.totalorder %s1472_s9, %s1466_s26 }
 0x3ad   : > { %v962_v61 = vrot.slane %v961_v60, 4 }
 0x3ae   : > { %v944_v0 = vpop.xlane.xlu1 %943  ;;  %v938_v1 = vpop.xlane.xlu0 %937  ;;  %p1475_p3 = por %p1474_p2, %p1473_p1 }
 0x3af   : > { %v963_v49 = vadd.f32 %v962_v61, %v961_v60  ;;  %v977_v29 = vadd.f32 %v946_v59, %v944_v0 }
 0x3b0   : > { %p1476_p4 = pnand %p1475_p3, %p1469_p0 }
 0x3b1   : > { %v964_v2 = vrot.slane %v963_v49, 2 }
 0x3b2   : > { %v948_v3 = vpop.xlane.xlu1 %947  ;;  %v940_v7 = vpop.xlane.xlu0 %939 }
 0x3b3   : > { %v965_v8 = vadd.f32 %v964_v2, %v963_v49  ;;  %v978_v33 = vadd.f32 %v977_v29, %v948_v3  ;;  %v1015_v49 = vrot.slane %v1351_v55, %v1014_v54 }
 0x3b5   : > { %v966_v9 = vrot.slane %v965_v8, 1 }
 0x3b6   : > { %v936_v12 = vpop.xlane.xlu1 %935  ;;  %v942_v13 = vpop.xlane.xlu0 %941 }
 0x3b7   : > { %v967_v15 = vadd.f32 %v966_v9, %v965_v8  ;;  %v968_v19 = vadd.f32 %v938_v1, %v936_v12  ;;  %v1085_v8 = vsub.s32 0, %v1013_v41 }
 0x3b9   : > { %v995_v20 = vmul.f32 0.00048828125, %v967_v15  ;;  %v969_v21 = vadd.f32 %v968_v19, %v940_v7 }
 0x3ba   : > { %v952_v24 = vpop.xlane.xlu1 %951  ;;  %v954_v25 = vpop.xlane.xlu0 %953 }
 0x3bb   : > { %v1059_v28 = vadd.f32 1e-05, %v995_v20  ;;  %v970_v30 = vadd.f32 %v969_v21, %v942_v13  ;;  %v986_v39 = vadd.f32 %v954_v25, %v952_v24 }
 0x3bd   : > { %1458 = vrsqrt.f32 %v1059_v28  ;;  %v971_v34 = vrot.slane %v970_v30, 4  ;;  %v1008_v28 = vcombine.high %v1351_v55, %v1351_v55 }
 0x3be   : > { %v950_v35 = vpop.xlane.xlu1 %949  ;;  %v956_v36 = vpop.xlane.xlu0 %955 }
 0x3bf   : > { %v972_v38 = vadd.f32 %v971_v34, %v970_v30  ;;  %v979_v40 = vadd.f32 %v978_v33, %v950_v35  ;;  %v987_v45 = vadd.f32 %v986_v39, %v956_v36  ;;  %v1022_v30 = vrot.slane %v1008_v28, %v1014_v54  ;;  %v1352_v33 = vld.sshfl [vmem:[%s288_s12] sm:$0x33 pattern:$0x75316420] }
 0x3c0   : > { %v1023_v35 = vcombine.high %v1015_v49, %v1015_v49  ;;  %v1045_v37 = vrot.slane %v1352_v33, %v1014_v54  ;;  %v1038_v41 = vcombine.high %v1352_v33, %v1352_v33 }
 0x3c1   : > { %v973_v42 = vrot.slane %v972_v38, 2  ;;  %v980_v43 = vrot.slane %v979_v40, 4 }
 0x3c2   : > { %v958_v46 = vpop.xlane.xlu0 %957 }
 0x3c3   : > { %v974_v47 = vadd.f32 %v973_v42, %v972_v38  ;;  %v981_v48 = vadd.f32 %v980_v43, %v979_v40  ;;  %v988_v53 = vadd.f32 %v987_v45, %v958_v46  ;;  %v1053_v45 = vcombine.high %v1045_v37, %v1045_v37 }
 0x3c5   : > { %v975_v58 = vrot.slane %v974_v47, 1  ;;  %v982_v59 = vrot.slane %v981_v48, 2  ;;  %v989_v60 = vrot.slane %v988_v53, 4 }
 0x3c7   : > { %v976_v61 = vadd.f32 %v975_v58, %v974_v47  ;;  %v983_v0 = vadd.f32 %v982_v59, %v981_v48  ;;  %v990_v1 = vadd.f32 %v989_v60, %v988_v53  ;;  %v1052_v47 = vrot.slane %v1038_v41, %v1014_v54 }
 0x3c8   : > { %v1024_v58 = vcombine.high %v1022_v30, %v1022_v30 }
 0x3c9   : > { %v996_v2 = vmul.f32 0.00048828125, %v976_v61  ;;  %v984_v3 = vrot.slane %v983_v0, 1  ;;  %v991_v7 = vrot.slane %v990_v1, 2 }
 0x3ca   : > { %v1459_v9 = vpop.eup %1458 }
 0x3cb   : > { %v1060_v12 = vadd.f32 1e-05, %v996_v2  ;;  %v985_v13 = vadd.f32 %v984_v3, %v983_v0  ;;  %v992_v15 = vadd.f32 %v991_v7, %v990_v1  ;;  %v1067_v19 = vmul.f32 %v1459_v9, %v1015_v49 }
 0x3cc   : > { %v1054_v1 = vcombine.high %v1052_v47, %v1052_v47 }
 0x3cd   : > { %1460 = vrsqrt.f32 %v1060_v12  ;;  %v997_v20 = vmul.f32 0.00048828125, %v985_v13  ;;  %v993_v21 = vrot.slane %v992_v15, 1  ;;  %v1086_v24 = vrot.slane %v1067_v19, %v1085_v8 }
 0x3ce   : > { %v1071_v38 = vmul.f32 %v1067_v19, %v1918_v18 }
 0x3cf   : > { %v1061_v25 = vadd.f32 1e-05, %v997_v20  ;;  %v994_v26 = vadd.f32 %v993_v21, %v992_v15  ;;  %1100 = vperm.xlu1 %1456, %v1086_v24  }
 0x3d0   : > { %v1075_v43 = vsub.f32 %v1045_v37, %v1071_v38 }
 0x3d1   : > { %1462 = vrsqrt.f32 %v1061_v25  ;;  %v998_v4 = vmul.f32 0.00048828125, %v994_v26 }
 0x3d2   : > { %v1138_v48 = vrot.slane %v1075_v43, %v1085_v8 }
 0x3d3   : > { %v1062_v29 = vadd.f32 1e-05, %v998_v4 }
 0x3d5   : > { %1464 = vrsqrt.f32 %v1062_v29 }
 0x3da   : > { %v1461_v32 = vpop.eup %1460 }
 0x3db   : > { %v1068_v34 = vmul.f32 %v1461_v32, %v1022_v30 }
 0x3dd   : > { %v1090_v36 = vrot.slane %v1068_v34, %v1085_v8  ;;  %v1072_v55 = vmul.f32 %v1068_v34, %v1934_v52 }
 0x3de   : > { %v1463_v39 = vpop.eup %1462 }
 0x3df   : > { %1104 = vperm.xlu0 %1457, %v1090_v36   ;;  %v1069_v40 = vmul.f32 %v1463_v39, %v1023_v35  ;;  %v1076_v60 = vsub.f32 %v1052_v47, %v1072_v55 }
 0x3e1   : > { %v1094_v42 = vrot.slane %v1069_v40, %v1085_v8  ;;  %v1073_v46 = vmul.f32 %v1069_v40, %v1931_v44  ;;  %v1142_v0 = vrot.slane %v1076_v60, %v1085_v8 }
 0x3e2   : > { %v1465_v59 = vpop.eup %1464 }
 0x3e3   : > { %1108 = vperm.xlu1 %1456, %v1094_v42   ;;  %v1077_v53 = vsub.f32 %v1053_v45, %v1073_v46  ;;  %v1070_v61 = vmul.f32 %v1465_v59, %v1024_v58 }
 0x3e5   : > { %v1146_v18 = vrot.slane %v1077_v53, %v1085_v8  ;;  %v1074_v49 = vmul.f32 %v1070_v61, %v1954_v14  ;;  %v1098_v44 = vrot.slane %v1070_v61, %v1085_v8 }
 0x3e7   : > { %1152 = vperm.xlu1 %1456, %v1138_v48   ;;  %v1078_v54 = vsub.f32 %v1054_v1, %v1074_v49 }
 0x3e9   : > { %v1150_v2 = vrot.slane %v1078_v54, %v1085_v8 }
 0x3eb   : > { %1160 = vperm.xlu1 %1456, %v1146_v18  }
 0x3ef   : > { %1156 = vperm.xlu1 %1456, %v1142_v0  }
 0x3f3   : > { %1112 = vperm.xlu1 %1456, %v1098_v44  }
 0x3f7   : > { %1164 = vperm.xlu1 %1456, %v1150_v2  }
 0x44a   : > { %v1101_v52 = vpop.permute.xlu1 %1100 }
 0x44b   : > { %v1115_v7 = vmul.f32 %v1101_v52, %v1854_v50  ;;  %v1116_v9 = vmul.f32 %v1101_v52, %v1862_v56  ;;  %v1117_v12 = vmul.f32 %v1101_v52, %v1870_v62  ;;  %v1118_v13 = vmul.f32 %v1101_v52, %v1878_v5 }
 0x45a   : > { %v1105_v56 = vpop.permute.xlu0 %1104 }
 0x45b   : > { %v1119_v29 = vmul.f32 %v1105_v56, %v1884_v10  ;;  %v1120_v30 = vmul.f32 %v1105_v56, %v1892_v16  ;;  %v1121_v32 = vmul.f32 %v1105_v56, %v1902_v23  ;;  %v1122_v33 = vmul.f32 %v1105_v56, %v1856_v51 }
 0x45e   : > { %v1109_v3 = vpop.permute.xlu1 %1108 }
 0x45f   : > { %v1123_v8 = vmul.f32 %v1109_v3, %v1864_v57  ;;  %v1124_v24 = vmul.f32 %v1109_v3, %v1872_v63  ;;  %v1125_v25 = vmul.f32 %v1109_v3, %v1880_v6  ;;  %v1126_v50 = vmul.f32 %v1109_v3, %v1886_v11 }
 0x462   : > { %v1153_v14 = vpop.permute.xlu1 %1152 }
 0x463   : > { %v1167_v15 = vadd.f32 %v1153_v14, %v1115_v7  ;;  %v1168_v19 = vadd.f32 %v1153_v14, %v1116_v9  ;;  %v1169_v20 = vadd.f32 %v1153_v14, %v1117_v12  ;;  %v1170_v21 = vadd.f32 %v1153_v14, %v1118_v13 }
 0x465   : > { %v1183_v26 = vmax.f32 %v1167_v15, 0.0  ;;  %v1184_v62 = vmax.f32 %v1168_v19, 0.0  ;;  %v1185_v4 = vmax.f32 %v1169_v20, 0.0  ;;  %v1186_v5 = vmax.f32 %v1170_v21, 0.0 }
 0x466   : > { %v1161_v28 = vpop.permute.xlu1 %1160 }
 0x467   : > { %1199 = vst [vmem:[%s2004_s15] sm:$0xff] %v1183_v26  ;;  %1200 = vst [vmem:[%s2004_s15 + $0x8] sm:$0xff] %v1184_v62  ;;  %v1175_v57 = vadd.f32 %v1161_v28, %v1123_v8  ;;  %v1176_v63 = vadd.f32 %v1161_v28, %v1124_v24  ;;  %v1177_v6 = vadd.f32 %v1161_v28, %v1125_v25 }
 0x468   : > { %1201 = vst [vmem:[%s2004_s15 + $0x10] sm:$0xff] %v1185_v4  ;;  %1202 = vst [vmem:[%s2004_s15 + $0x18] sm:$0xff] %v1186_v5  ;;  %v1178_v11 = vadd.f32 %v1161_v28, %v1126_v50 }
 0x469   : > { %v1191_v34 = vmax.f32 %v1175_v57, 0.0  ;;  %v1192_v35 = vmax.f32 %v1176_v63, 0.0  ;;  %v1193_v36 = vmax.f32 %v1177_v6, 0.0 }
 0x46a   : > { %v1194_v37 = vmax.f32 %v1178_v11, 0.0  ;;  %v1157_v38 = vpop.permute.xlu1 %1156 }
 0x46b   : > { %1207 = vst [vmem:[%s2004_s15 + $0x40] sm:$0xff] %v1191_v34  ;;  %1208 = vst [vmem:[%s2004_s15 + $0x48] sm:$0xff] %v1192_v35  ;;  %v1171_v10 = vadd.f32 %v1157_v38, %v1119_v29  ;;  %v1172_v39 = vadd.f32 %v1157_v38, %v1120_v30  ;;  %v1173_v16 = vadd.f32 %v1157_v38, %v1121_v32 }
 0x46c   : > { %1209 = vst [vmem:[%s2004_s15 + $0x50] sm:$0xff] %v1193_v36  ;;  %1210 = vst [vmem:[%s2004_s15 + $0x58] sm:$0xff] %v1194_v37  ;;  %v1174_v23 = vadd.f32 %v1157_v38, %v1122_v33 }
 0x46d   : > { %v1187_v51 = vmax.f32 %v1171_v10, 0.0  ;;  %v1188_v40 = vmax.f32 %v1172_v39, 0.0  ;;  %v1189_v41 = vmax.f32 %v1173_v16, 0.0 }
 0x46e   : > { %v1190_v42 = vmax.f32 %v1174_v23, 0.0  ;;  %v1113_v43 = vpop.permute.xlu1 %1112 }
 0x46f   : > { %1203 = vst [vmem:[%s2004_s15 + $0x20] sm:$0xff] %v1187_v51  ;;  %1204 = vst [vmem:[%s2004_s15 + $0x28] sm:$0xff] %v1188_v40  ;;  %v1127_v45 = vmul.f32 %v1113_v43, %v1894_v17  ;;  %v1128_v46 = vmul.f32 %v1113_v43, %v1900_v22  ;;  %v1129_v47 = vmul.f32 %v1113_v43, %v1908_v27 }
 0x470   : > { %1205 = vst [vmem:[%s2004_s15 + $0x30] sm:$0xff] %v1189_v41  ;;  %1206 = vst [vmem:[%s2004_s15 + $0x38] sm:$0xff] %v1190_v42  ;;  %v1130_v48 = vmul.f32 %v1113_v43, %v1914_v31 }
 0x472   : > { %v1165_v53 = vpop.permute.xlu1 %1164 }
 0x473   : > { %v1179_v55 = vadd.f32 %v1165_v53, %v1127_v45  ;;  %v1180_v58 = vadd.f32 %v1165_v53, %v1128_v46  ;;  %v1181_v59 = vadd.f32 %v1165_v53, %v1129_v47  ;;  %v1182_v18 = vadd.f32 %v1165_v53, %v1130_v48 }
 0x475   : > { %v1195_v17 = vmax.f32 %v1179_v55, 0.0  ;;  %v1196_v22 = vmax.f32 %v1180_v58, 0.0  ;;  %v1197_v27 = vmax.f32 %v1181_v59, 0.0  ;;  %v1198_v31 = vmax.f32 %v1182_v18, 0.0 }
 0x477   : > { %1211 = vst [vmem:[%s2004_s15 + $0x60] sm:$0xff] %v1195_v17  ;;  %1212 = vst [vmem:[%s2004_s15 + $0x68] sm:$0xff] %v1196_v22 }
 0x478   : > { %1213 = vst [vmem:[%s2004_s15 + $0x70] sm:$0xff] %v1197_v27  ;;  %1214 = vst [vmem:[%s2004_s15 + $0x78] sm:$0xff] %v1198_v31 }
 0x479   : > { %1479 = shalt.err (!%p1476_p4)
}
 0x47a   : > { %s1480_s10 = scalar_lea.hbm %s2031_s20, 2048  ;;  %s1484_s13 = scalar_lea.hbm %s2087_s6, 4096 }
 0x47b   : > { %p1481_p7 = scmp.ne.s32.totalorder %s2031_s20, %s1480_s10  ;;  %p1485_p10 = scmp.lt.s32.totalorder %s2031_s20, %s2087_s6 }
 0x47c   : > { %p1486_p11 = scmp.lt.s32.totalorder %s1484_s13, %s1480_s10 }
 0x47d   : > { %p1482_p8 = pnand %p1481_p7, %p1609_p5 }
 0x47e   : > { %p1487_p12 = por %p1486_p11, %p1485_p10 }
 0x47f   : > { %p1483_p9 = pneg %p1482_p8 }
 0x481   : > { %p1488_p13 = pnand %p1487_p12, %p1483_p9 }
 0x483   : > { %1491 = shalt.err (!%p1488_p13)
}
 0x484   : > { %s1534_s16 = smov 128   ;;  %s1535_s18 = smov 8  }
 0x485   : > { %1410 = dma.vmem_to_hbm [thread:$0]  (%p1609_p5), %s2033_s17, 2048, %s2031_s20, %s2041_s25, %s1534_s16, %s1534_s16, %s1535_s18  }
 0x486 PF: > { %p1416_p0 = scmp.ge.s32.totalorder %s1526_s24, 2  ;;  %s1245_s19 = sand.u32 1, %s1514_s21  }
 0x487   : > { %s1246_s26 = scalar_lea.sflag [#allocation3], %s1245_s19 }
 0x488   : > { %p1413_p1 = pnand %p1416_p0, %p1613_p6 }
 0x48a   : > { %p1414_p2 = pneg %p1413_p1 }
 0x48c   : > { %1509 = dma.done.wait (%p1414_p2), %s1246_s26, 2048  }
 0x48d   : > { %1511 = vsyncadd (%p1414_p2), %s1246_s26, 4294965248  ;;  %p16_p3 = scmp.ge.s32.totalorder %s1596_s27, 4   ;;  %s2090_s21 = smov %s1518_s22 }
 0x48e   : > { %s2091_s22 = smov %s1522_s23  ;;  %s2092_s23 = smov %s1607_s30 }
 0x48f   : > { %s2093_s24 = smov %s1596_s27  ;;  %18 = sbr.rel (!%p16_p3) target bundleno = 3 (0x3), region = 85 }
 0x494   :  { %1251 = vsyncpa [#allocation3], 1 }
 0x495   :  { %1253 = vsyncpa [#allocation3 + $0x1], 1 }

</bundles_post_ra>
